<compile_context>
chip_gen: v5e
topology: v5e:2x2
jax: 0.10.0
libtpu: 0.0.40
codegen_flags: <defaults>
</compile_context>

<pallas_src>
import jax
import jax.numpy as jnp
from jax import lax
from jax.experimental import pallas as pl
from jax.experimental.pallas import tpu as pltpu

_LANE = 128


# ---------------------------------------------------------------------------
# Pallas kernel: whole 3-layer MLP, batch-major input block [tile, d_in]
# ---------------------------------------------------------------------------
def deepsurv_kernel(x_ref, w1_ref, b1_ref, w2_ref, b2_ref, w3_ref, b3_ref,
                    o_ref):
    # x block: [tile, d_in], exactly the HBM layout. Cast to MXU operand dtype
    # on the VPU (no-op when compute dtype is f32).
    x = x_ref[...].astype(w1_ref.dtype)

    # Layer 1: contract x's feature (last) axis -> h: [d1, tile].
    # Batch stays on the 128-lane axis; f32 accumulation on the MXU.
    h = lax.dot_general(w1_ref[...], x, (((1,), (1,)), ((), ())),
                        preferred_element_type=jnp.float32)
    h = jnp.maximum(h + b1_ref[...], 0.0)                      # bias col + ReLU (f32)

    # Layer 2: [d2, d1] @ [d1, tile] -> [d2, tile]
    h = jnp.dot(w2_ref[...], h.astype(w2_ref.dtype),
                preferred_element_type=jnp.float32)
    h = jnp.maximum(h + b2_ref[...], 0.0)

    # Layer 3 (d2 -> 1): keep it off the MXU (N=1 systolic push is wasteful).
    # Broadcast multiply by the weight column + sublane reduce.
    y = jnp.sum(w3_ref[...] * h, axis=0, keepdims=True) + b3_ref[...]   # [1, tile]
    o_ref[...] = jnp.maximum(y, 0.0).astype(o_ref.dtype)


# ---------------------------------------------------------------------------
# Wrapper: tile selection + BlockSpecs + pallas_call (no extra passes over x)
# ---------------------------------------------------------------------------
def deepsurv_forward(x, params, *, batch_tile=16384,
                     compute_dtype=jnp.bfloat16):
    """x: [B, dims[0]].
    params: dict of (Wi, bi) in torch convention (Wi: [out, in], bi: [out]).
    batch_tile: max rows per grid step (multiple of 128).
    compute_dtype: dtype of the MXU operands (bf16 default); epilogues stay f32.
    """
    B, d_in = x.shape
    assert batch_tile % _LANE == 0, "batch_tile must be a multiple of 128"

    if B <= 1024:
        # Single grid step; block == full array so any B is a legal block shape.
        tile = B
    else:
        # At least 2 grid steps so ("parallel",) can shard across the two
        # TensorCores on v7x; tile is a multiple of 512 lanes.  A partial
        # trailing block is handled by Pallas boundary clipping.
        half = -(-B // 2)
        tile = min(batch_tile, -(-half // 512) * 512)
    grid = (pl.cdiv(B, tile),)

    # Torch weights are [out, in], i.e. already the W of  h = W @ x^T.
    w1 = params["w1"].astype(compute_dtype)            # [d1, d_in]
    w2 = params["w2"].astype(compute_dtype)            # [d2, d1]
    w3 = params["w3"].T.astype(jnp.float32)            # [d2, 1]  (VPU head, f32)
    b1 = params["b1"][:, None].astype(jnp.float32)     # [d1, 1]
    b2 = params["b2"][:, None].astype(jnp.float32)     # [d2, 1]
    b3 = params["b3"][:, None].astype(jnp.float32)     # [1, 1]

    # Small arrays: full-array blocks with constant index maps -> VMEM-resident.
    full = lambda a: pl.BlockSpec(a.shape, lambda i: (0, 0))

    out = pl.pallas_call(
        deepsurv_kernel,
        out_shape=jax.ShapeDtypeStruct((1, B), jnp.float32),
        grid_spec=pltpu.PrefetchScalarGridSpec(
            num_scalar_prefetch=0,
            grid=grid,
            in_specs=[
                pl.BlockSpec((tile, d_in), lambda i: (i, 0)),     # x tile, batch-major
                full(w1), full(b1),
                full(w2), full(b2),
                full(w3), full(b3),
            ],
            out_specs=pl.BlockSpec((1, tile), lambda i: (0, i)),  # lane-dense output
        ),
        compiler_params=pltpu.CompilerParams(
            dimension_semantics=("parallel",),
            vmem_limit_bytes=48 * 1024 * 1024,
        ),
    )(x, w1, b1, w2, b2, w3, b3)

    # (1, B) -> (B, 1) torch layout; this is a free relayout of a size-1 axis.
    return out.T


# ---------------------------------------------------------------------------
# Deterministic parameter init (mimics torch.nn.Linear default: U(-k, k),
# k = 1/sqrt(fan_in)) and a pure-JAX reference for checking.
# ---------------------------------------------------------------------------
def init_params(key, dims):
    params = {}
    for li in range(len(dims) - 1):
        fan_in, fan_out = dims[li], dims[li + 1]
        k = 1.0 / jnp.sqrt(jnp.float32(fan_in))
        key, kw, kb = jax.random.split(key, 3)
        params[f"w{li + 1}"] = jax.random.uniform(
            kw, (fan_out, fan_in), jnp.float32, -k, k)
        params[f"b{li + 1}"] = jax.random.uniform(
            kb, (fan_out,), jnp.float32, -k, k)
    return params


def deepsurv_reference(x, params):
    h = x
    for li in (1, 2, 3):
        h = h @ params[f"w{li}"].T + params[f"b{li}"]
        h = jnp.maximum(h, 0.0)
    return h


if __name__ == "__main__":
    dims = [16, 32, 32, 1]      # config['dims']

    key = jax.random.PRNGKey(0)
    key, kx1, kx2 = jax.random.split(key, 3)
    params = init_params(key, dims)

    # 1) Small batch, f32 operands, single grid step (block == full batch).
    x_small = jax.random.normal(kx1, (8, dims[0]), jnp.float32)
    out = jax.block_until_ready(
        deepsurv_forward(x_small, params, compute_dtype=jnp.float32))
    ref = deepsurv_reference(x_small, params)
    assert out.shape == (8, dims[-1])
    assert jnp.allclose(out, ref, atol=1e-5, rtol=1e-5)

    # 2) Larger non-divisible batch, small tile -> multi-step grid with a
    #    clipped trailing block (exercises pipelining + boundary masking), f32.
    x_big = jax.random.normal(kx2, (2500, dims[0]), jnp.float32)
    out = jax.block_until_ready(
        deepsurv_forward(x_big, params, batch_tile=512,
                         compute_dtype=jnp.float32))
    ref = deepsurv_reference(x_big, params)
    assert out.shape == (2500, dims[-1])
    assert jnp.allclose(out, ref, atol=1e-5, rtol=1e-5)

    # 3) Default path: bf16 MXU operands (f32 accumulate + f32 epilogues),
    #    default tile -> 2 parallel grid steps (v7x megacore friendly).
    out_bf16 = jax.block_until_ready(deepsurv_forward(x_big, params))
    assert out_bf16.shape == (2500, dims[-1])
    assert jnp.allclose(out_bf16, ref, atol=5e-2, rtol=5e-2)

    print("KERNEL_OK")
</pallas_src>

<mosaic_0001>
module attributes {stable_mosaic.version = 11 : i64} {
  func.func @deepsurv_kernel(%arg0: i32, %arg1: memref<8x16xf32, #tpu.memory_space<vmem>>, %arg2: memref<32x16xf32, #tpu.memory_space<vmem>>, %arg3: memref<32x1xf32, #tpu.memory_space<vmem>>, %arg4: memref<32x32xf32, #tpu.memory_space<vmem>>, %arg5: memref<32x1xf32, #tpu.memory_space<vmem>>, %arg6: memref<32x1xf32, #tpu.memory_space<vmem>>, %arg7: memref<1x1xf32, #tpu.memory_space<vmem>>, %arg8: memref<1x8xf32, #tpu.memory_space<vmem>>) attributes {dimension_semantics = [#tpu.dimension_semantics<parallel>], iteration_bounds = array<i64: 1>, scalar_prefetch = 0 : i64, scratch_operands = 0 : i64, tpu.core_type = #tpu.core_type<tc>, window_params = [{transform_indices = @transform_0, window_bounds = array<i64: 8, 16>}, {pipeline_mode = #tpu.pipeline_mode<synchronous>, transform_indices = @transform_1, window_bounds = array<i64: 32, 16>}, {pipeline_mode = #tpu.pipeline_mode<synchronous>, transform_indices = @transform_2, window_bounds = array<i64: 32, 1>}, {pipeline_mode = #tpu.pipeline_mode<synchronous>, transform_indices = @transform_3, window_bounds = array<i64: 32, 32>}, {pipeline_mode = #tpu.pipeline_mode<synchronous>, transform_indices = @transform_4, window_bounds = array<i64: 32, 1>}, {pipeline_mode = #tpu.pipeline_mode<synchronous>, transform_indices = @transform_5, window_bounds = array<i64: 32, 1>}, {pipeline_mode = #tpu.pipeline_mode<synchronous>, transform_indices = @transform_6, window_bounds = array<i64: 1, 1>}, {transform_indices = @transform_7, window_bounds = array<i64: 1, 8>}]} {
    %c0 = arith.constant 0 : index
    %c0_0 = arith.constant 0 : index
    %0 = vector.load %arg1[%c0, %c0_0] : memref<8x16xf32, #tpu.memory_space<vmem>>, vector<8x16xf32>
    %c0_1 = arith.constant 0 : index
    %c0_2 = arith.constant 0 : index
    %1 = vector.load %arg2[%c0_1, %c0_2] : memref<32x16xf32, #tpu.memory_space<vmem>>, vector<32x16xf32>
    %cst = arith.constant dense<0.000000e+00> : vector<32x8xf32>
    %2 = tpu.matmul %1, %0, %cst {dimension_numbers = #tpu.dot_dimension_numbers<[1], [1], [0], [0], [0, 0, 1, 0], [], []>} : vector<32x16xf32>, vector<8x16xf32>, vector<32x8xf32> -> vector<32x8xf32>
    %c0_3 = arith.constant 0 : index
    %c0_4 = arith.constant 0 : index
    %3 = vector.load %arg3[%c0_3, %c0_4] : memref<32x1xf32, #tpu.memory_space<vmem>>, vector<32x1xf32>
    %4 = vector.broadcast %3 : vector<32x1xf32> to vector<32x8xf32>
    %5 = arith.addf %2, %4 : vector<32x8xf32>
    %cst_5 = arith.constant 0.000000e+00 : f32
    %6 = vector.broadcast %cst_5 : f32 to vector<32x8xf32>
    %7 = arith.maximumf %5, %6 : vector<32x8xf32>
    %c0_6 = arith.constant 0 : index
    %c0_7 = arith.constant 0 : index
    %8 = vector.load %arg4[%c0_6, %c0_7] : memref<32x32xf32, #tpu.memory_space<vmem>>, vector<32x32xf32>
    %cst_8 = arith.constant dense<0.000000e+00> : vector<32x8xf32>
    %9 = tpu.matmul %8, %7, %cst_8 {dimension_numbers = #tpu.dot_dimension_numbers<[1], [0], [0], [1], [0, 0, 1, 1], [], []>} : vector<32x32xf32>, vector<32x8xf32>, vector<32x8xf32> -> vector<32x8xf32>
    %c0_9 = arith.constant 0 : index
    %c0_10 = arith.constant 0 : index
    %10 = vector.load %arg5[%c0_9, %c0_10] : memref<32x1xf32, #tpu.memory_space<vmem>>, vector<32x1xf32>
    %11 = vector.broadcast %10 : vector<32x1xf32> to vector<32x8xf32>
    %12 = arith.addf %9, %11 : vector<32x8xf32>
    %cst_11 = arith.constant 0.000000e+00 : f32
    %13 = vector.broadcast %cst_11 : f32 to vector<32x8xf32>
    %14 = arith.maximumf %12, %13 : vector<32x8xf32>
    %c0_12 = arith.constant 0 : index
    %c0_13 = arith.constant 0 : index
    %15 = vector.load %arg6[%c0_12, %c0_13] : memref<32x1xf32, #tpu.memory_space<vmem>>, vector<32x1xf32>
    %16 = vector.broadcast %15 : vector<32x1xf32> to vector<32x8xf32>
    %17 = arith.mulf %16, %14 : vector<32x8xf32>
    %cst_14 = arith.constant dense<0.000000e+00> : vector<8xf32>
    %18 = vector.multi_reduction <add>, %17, %cst_14 [0] : vector<32x8xf32> to vector<8xf32>
    %19 = vector.shape_cast %18 : vector<8xf32> to vector<1x8xf32>
    %c0_15 = arith.constant 0 : index
    %c0_16 = arith.constant 0 : index
    %20 = vector.load %arg7[%c0_15, %c0_16] : memref<1x1xf32, #tpu.memory_space<vmem>>, vector<1x1xf32>
    %21 = vector.broadcast %20 : vector<1x1xf32> to vector<1x8xf32>
    %22 = arith.addf %19, %21 : vector<1x8xf32>
    %cst_17 = arith.constant 0.000000e+00 : f32
    %23 = vector.broadcast %cst_17 : f32 to vector<1x8xf32>
    %24 = arith.maximumf %22, %23 : vector<1x8xf32>
    %c0_18 = arith.constant 0 : index
    %c0_19 = arith.constant 0 : index
    %25 = vector.load %arg8[%c0_18, %c0_19] : memref<1x8xf32, #tpu.memory_space<vmem>>, vector<1x8xf32>
    tpu.vector_store %arg8[%c0_18, %c0_19], %24 {strides = array<i32>} : memref<1x8xf32, #tpu.memory_space<vmem>>, vector<1x8xf32>,
    return
  }
  func.func @transform_0(%arg0: i32) -> (i32, i32) {
    %c0_i32 = arith.constant 0 : i32
    %c0_i32_0 = arith.constant 0 : i32
    return %arg0, %c0_i32 : i32, i32
  }
  func.func @transform_1(%arg0: i32) -> (i32, i32) {
    %c0_i32 = arith.constant 0 : i32
    %c0_i32_0 = arith.constant 0 : i32
    %c0_i32_1 = arith.constant 0 : i32
    return %c0_i32, %c0_i32_0 : i32, i32
  }
  func.func @transform_2(%arg0: i32) -> (i32, i32) {
    %c0_i32 = arith.constant 0 : i32
    %c0_i32_0 = arith.constant 0 : i32
    %c0_i32_1 = arith.constant 0 : i32
    return %c0_i32, %c0_i32_0 : i32, i32
  }
  func.func @transform_3(%arg0: i32) -> (i32, i32) {
    %c0_i32 = arith.constant 0 : i32
    %c0_i32_0 = arith.constant 0 : i32
    %c0_i32_1 = arith.constant 0 : i32
    return %c0_i32, %c0_i32_0 : i32, i32
  }
  func.func @transform_4(%arg0: i32) -> (i32, i32) {
    %c0_i32 = arith.constant 0 : i32
    %c0_i32_0 = arith.constant 0 : i32
    %c0_i32_1 = arith.constant 0 : i32
    return %c0_i32, %c0_i32_0 : i32, i32
  }
  func.func @transform_5(%arg0: i32) -> (i32, i32) {
    %c0_i32 = arith.constant 0 : i32
    %c0_i32_0 = arith.constant 0 : i32
    %c0_i32_1 = arith.constant 0 : i32
    return %c0_i32, %c0_i32_0 : i32, i32
  }
  func.func @transform_6(%arg0: i32) -> (i32, i32) {
    %c0_i32 = arith.constant 0 : i32
    %c0_i32_0 = arith.constant 0 : i32
    %c0_i32_1 = arith.constant 0 : i32
    return %c0_i32, %c0_i32_0 : i32, i32
  }
  func.func @transform_7(%arg0: i32) -> (i32, i32) {
    %c0_i32 = arith.constant 0 : i32
    %c0_i32_0 = arith.constant 0 : i32
    return %c0_i32, %arg0 : i32, i32
  }
}

</mosaic_0001>

<bundles_post_ra>
// kernel: tpu_custom_call.1
= control target key start
LH: loop header
LB: loop body
LE: loop exit
PB: predicated region body
PF: predicated region fallthrough
CT: control target
= control target key end

     0   :  { %s412_s0 = inlined_call_operand.vmem [shape: f32[8,16], index: 0, kind: input, shape index: {}]   ;;  %s413_s1 = inlined_call_operand.vmem [shape: f32[32,16], index: 1, kind: input, shape index: {}]   ;;  %s414_s2 = inlined_call_operand.vmem [shape: f32[32,1], index: 2, kind: input, shape index: {}]   ;;  %s415_s3 = inlined_call_operand.vmem [shape: f32[32,32], index: 3, kind: input, shape index: {}]   ;;  %s416_s4 = inlined_call_operand.vmem [shape: f32[32,1], index: 4, kind: input, shape index: {}]   ;;  %s417_s5 = inlined_call_operand.vmem [shape: f32[32,1], index: 5, kind: input, shape index: {}]   ;;  %s418_s6 = inlined_call_operand.<no memory space> [shape: f32[1,1], index: 6, kind: input, shape index: {}]   ;;  %s419_s7 = inlined_call_operand.hbm [shape: f32[1,8], index: 7, kind: output, shape index: {}]  }
   0x1   :  { %v12_v0 = vstv %s418_s6 }
   0x2   :  { %13 = vst [vmem:[#allocation2] sm:$0x1] %v12_v0 }
   0x3   :  { %v29_v1 = vld [vmem:[%s412_s0] sm:$0xff]  ;;  %vm58_vm0 = vcmask 130048   ;;  %v37_v2 = vld [vmem:[%s414_s2 + $0x18] sm:$0xff]  ;;  %v295_v3 = vmov 0   ;;  %v31_v4 = vld [vmem:[%s413_s1 + $0x8] sm:$0xff] }
   0x4   :  { %266 = vset.pattern.permute.xlu0 %v295_v3  ;;  %259 = vmatpush.xpose.msk.msra.mxu3 %vm58_vm0, %v29_v1  ;;  %v35_v5 = vld [vmem:[%s414_s2 + $0x8] sm:$0xff]  ;;  %v30_v6 = vld [vmem:[%s413_s1] sm:$0xff] }
   0x5   :  { %55 = vperm.xlu0 %266, %v37_v2   ;;  %267 = vset.pattern.permute.xlu1 %v295_v3 }
   0x6   :  { %45 = vperm.xlu1 %267, %v35_v5   ;;  %250 = vmatpush.xpose.msk.msra.mxu0 %vm58_vm0, %v29_v1 }
   0x7   :  { %252 = vmatmul.msk.f32.vlgmr.msra.gmra.mxu3 %vm58_vm0, %v31_v4  ;;  %268 = vset.pattern.permute.xlu2 %v295_v3 }
   0x8   :  { %14 = vsyncpa [#allocation4], 0  ;;  %v36_v7 = vld [vmem:[%s414_s2 + $0x10] sm:$0xff]  ;;  %v34_v8 = vld [vmem:[%s414_s2] sm:$0xff]  ;;  %vm135_vm1 = vcmask 261120   ;;  %vm209_vm2 = vcmask 64512  }
   0x9   :  { %251 = vmatmul.msk.f32.vlgmr.msra.gmra.mxu0 %vm58_vm0, %v30_v6  ;;  %v32_v9 = vld [vmem:[%s413_s1 + $0x10] sm:$0xff]  ;;  %v114_v11 = vld [vmem:[%s416_s4 + $0x18] sm:$0xff]  ;;  %v182_v13 = vld [vmem:[%s417_s5 + $0x8] sm:$0xff]  ;;  %s241_s17 = sshll.u32 %s419_s7, 4  ;;  %vm232_vm3 = vcmask 57344   ;;  %s242_s17 = int_to_ptr.hbm [resolvable:$true] %s241_s17 }
   0xa   :  { %v113_v10 = vld [vmem:[%s416_s4 + $0x10] sm:$0xff]  ;;  %v33_v12 = vld [vmem:[%s413_s1 + $0x18] sm:$0xff]  ;;  %v223_v15 = vld [vmem:[#allocation2] sm:$0x1] }
   0xb   :  { %v183_v14 = vld [vmem:[%s417_s5 + $0x10] sm:$0xff]  ;;  %v111_v16 = vld [vmem:[%s416_s4] sm:$0xff]  ;;  %v112_v18 = vld [vmem:[%s416_s4 + $0x8] sm:$0xff] }
   0xc   :  { %117 = vperm.xlu2 %268, %v111_v16   ;;  %v181_v22 = vld [vmem:[%s417_s5] sm:$0xff]  ;;  %v184_v30 = vld [vmem:[%s417_s5 + $0x18] sm:$0xff]  ;;  %v109_v37 = vld [vmem:[%s415_s3 + $0x10] sm:$0xff] }
   0xd   :  { %50 = vperm.xlu0 %266, %v36_v7   ;;  %v107_v36 = vld [vmem:[%s415_s3] sm:$0xff]  ;;  %v108_v38 = vld [vmem:[%s415_s3 + $0x8] sm:$0xff]  ;;  %v110_v39 = vld [vmem:[%s415_s3 + $0x18] sm:$0xff]  ;;  %s296_s3 = smov [#allocation3]  }
   0xe   :  { %40 = vperm.xlu1 %267, %v34_v8   ;;  %s239_s14 = sshll.u32 %s296_s3, 4  ;;  %s240_s14 = int_to_ptr.vmem [resolvable:$true] %s239_s14 }
   0xf   :  { %253 = vmatmul.msk.f32.gmra.mxu3 %vm58_vm0, %v32_v9 }
  0x14   :  { %122 = vperm.xlu2 %268, %v112_v18  }
  0x15   :  { %127 = vperm.xlu0 %266, %v113_v10  }
  0x16   :  { %132 = vperm.xlu1 %267, %v114_v11  }
  0x17   :  { %254 = vmatmul.msk.f32.gmra.mxu3 %vm58_vm0, %v33_v12 }
  0x1c   :  { %187 = vperm.xlu2 %268, %v181_v22  }
  0x1d   :  { %192 = vperm.xlu0 %266, %v182_v13  }
  0x1e   :  { %197 = vperm.xlu1 %267, %v183_v14  }
  0x24   :  { %202 = vperm.xlu2 %268, %v184_v30  }
  0x25   :  { %226 = vperm.xlu0 %266, %v223_v15  }
  0x66   :  { %v118_v40 = vpop.permute.xlu2 %117 }
  0x6e   :  { %v123_v41 = vpop.permute.xlu2 %122 }
  0x76   :  { %v188_v49 = vpop.permute.xlu2 %187 }
  0x77   :  { %v56_v19 = vpop.permute.xlu0 %55 }
  0x78   :  { %v46_v21 = vpop.permute.xlu1 %45 }
  0x7e   :  { %v203_v1 = vpop.permute.xlu2 %202 }
  0x7f   :  { %v51_v23 = vpop.permute.xlu0 %50 }
  0x80   :  { %v41_v31 = vpop.permute.xlu1 %40 }
  0x86   :  { %v91_v27 = vpop.f32.mrf.mxu0 }
  0x87   :  { %v92_v33 = vadd.f32 %v91_v27, %v41_v31  ;;  %v128_v43 = vpop.permute.xlu0 %127 }
  0x88   :  { %v133_v45 = vpop.permute.xlu1 %132 }
  0x89   :  { %v103_v35 = vmax.f32 %v92_v33, 0.0 }
  0x8a   :  { %v94_v17 = vpop.f32.mrf.mxu3 }
  0x8b   :  { %v95_v28 = vadd.f32 %v94_v17, %v46_v21 }
  0x8d   :  { %v104_v34 = vmax.f32 %v95_v28, 0.0 }
  0x8f   :  { %v193_v55 = vpop.permute.xlu0 %192 }
  0x90   :  { %v198_v57 = vpop.permute.xlu1 %197 }
  0x92   :  { %v97_v20 = vpop.f32.mrf.mxu3 }
  0x93   :  { %v98_v25 = vadd.f32 %v97_v20, %v51_v23 }
  0x95   :  { %v105_v32 = vmax.f32 %v98_v25, 0.0 }
  0x97   :  { %v227_v11 = vpop.permute.xlu0 %226 }
  0x98   :  { %v229_v13 = vperm.slane %v227_v11, 0 }
  0x9a   :  { %v100_v24 = vpop.f32.mrf.mxu3 }
  0x9b   :  { %v101_v26 = vadd.f32 %v100_v24, %v56_v19 }
  0x9d   :  { %v106_v29 = vmax.f32 %v101_v26, 0.0 }
  0x9f   :  { %160 = vmatpush.msra.mxu1 %v106_v29  ;;  %260 = vmatpush.msra.mxu2 %v106_v29 }
  0xa1   :  { %161 = vmatpush.msra.mxu1 %v105_v32  ;;  %261 = vmatpush.msra.mxu2 %v105_v32 }
  0xa3   :  { %162 = vmatpush.msra.mxu1 %v104_v34  ;;  %262 = vmatpush.msra.mxu2 %v104_v34 }
  0xa5   :  { %163 = vmatpush.msra.mxu1 %v103_v35  ;;  %263 = vmatpush.msra.mxu2 %v103_v35 }
  0xa6   :  { %255 = vmatmul.msk.f32.vlgmr.msra.gmra.mxu1 %vm135_vm1, %v107_v36  ;;  %257 = vmatmul.msk.f32.vlgmr.msra.gmra.mxu2 %vm135_vm1, %v109_v37 }
  0xae   :  { %256 = vmatmul.msk.f32.gmra.mxu1 %vm135_vm1, %v108_v38  ;;  %258 = vmatmul.msk.f32.gmra.mxu2 %vm135_vm1, %v110_v39 }
 0x123   :  { %v165_v42 = vpop.f32.mrf.mxu1 }
 0x124   :  { %v166_v44 = vadd.f32 %v165_v42, %v118_v40 }
 0x126   :  { %v177_v47 = vmax.f32 %v166_v44, 0.0 }
 0x128   :  { %v205_v52 = vmul.f32 %v188_v49, %v177_v47 }
 0x129   :  { %v171_v46 = vpop.f32.mrf.mxu2 }
 0x12a   :  { %v172_v48 = vadd.f32 %v171_v46, %v128_v43  ;;  %v210_v59 = vsel %vm209_vm2, %v205_v52, 0.0 }
 0x12b   :  { %v168_v50 = vpop.f32.mrf.mxu1 }
 0x12c   :  { %v169_v51 = vadd.f32 %v168_v50, %v123_v41  ;;  %v179_v53 = vmax.f32 %v172_v48, 0.0 }
 0x12e   :  { %v178_v54 = vmax.f32 %v169_v51, 0.0  ;;  %v207_v60 = vmul.f32 %v198_v57, %v179_v53 }
 0x130   :  { %v206_v56 = vmul.f32 %v193_v55, %v178_v54  ;;  %v213_v2 = vsel %vm209_vm2, %v207_v60, 0.0 }
 0x131   :  { %v174_v58 = vpop.f32.mrf.mxu2 }
 0x132   :  { %v211_v61 = vsel %vm209_vm2, %v206_v56, 0.0  ;;  %v175_v62 = vadd.f32 %v174_v58, %v133_v45 }
 0x133   :  { %v212_v63 = vadd.f32 %v211_v61, %v210_v59 }
 0x134   :  { %v180_v0 = vmax.f32 %v175_v62, 0.0 }
 0x135   :  { %v214_v4 = vadd.f32 %v213_v2, %v212_v63 }
 0x136   :  { %v208_v3 = vmul.f32 %v203_v1, %v180_v0 }
 0x138   :  { %v215_v5 = vsel %vm209_vm2, %v208_v3, 0.0 }
 0x139   :  { %v216_v6 = vadd.f32 %v215_v5, %v214_v4 }
 0x13b   :  { %v217_v7 = vrot.slane %v216_v6, 4 }
 0x13d   :  { %v218_v8 = vadd.f32 %v217_v7, %v216_v6 }
 0x13f   :  { %v219_v9 = vrot.slane %v218_v8, 2 }
 0x141   :  { %v220_v10 = vadd.f32 %v219_v9, %v218_v8 }
 0x143   :  { %v221_v12 = vrot.slane %v220_v10, 1 }
 0x145   :  { %v222_v14 = vadd.f32 %v221_v12, %v220_v10 }
 0x147   :  { %v230_v15 = vadd.f32 %v229_v13, %v222_v14 }
 0x149   :  { %v231_v16 = vmax.f32 %v230_v15, 0.0 }
 0x14b   :  { %233 = vst.msk [vmem:[#allocation3] sm:$0x1] %vm232_vm3, %v231_v16 }
 0x14c   :  { %244 = dma.vmem_to_hbm [thread:$0]  %s240_s14, 16, %s242_s17, [#allocation4]  }
 0x14d   :  { %293 = dma.done.wait [#allocation4], 16  }
 0x14e   :  { %294 = vsyncadd [#allocation4], 4294967280 }
 0x14f   :  { %249 = vsyncpa [#allocation4], 1 }

</bundles_post_ra>
